<compile_context>
chip_gen: v7x
topology: tpu7x:2x2x1
jax: 0.10.0
libtpu: 0.0.40
codegen_flags: <defaults>
</compile_context>

<pallas_src>
from functools import partial

import jax
import jax.numpy as jnp
from jax.experimental import pallas as pl
from jax.experimental.pallas import tpu as pltpu

HIDDEN = 128  # fc_1 output width
IN_DIM = 4    # CartPole state dim


def policy_kernel(xT_ref, w1T_ref, b1c_ref, wdc_ref, bdiff_ref, p1_ref):
    # xT_ref   : (IN_DIM, TM)   states, batch on lanes
    # w1T_ref  : (HIDDEN, IN_DIM) fc_1 weight, hidden on sublanes
    # b1c_ref  : (HIDDEN, 1)    fc_1 bias column
    # wdc_ref  : (HIDDEN, 1)    collapsed fc_2 weight column  w2[:,1] - w2[:,0]
    # bdiff_ref: (1, 1)         collapsed fc_2 bias           b2[1]  - b2[0]
    # p1_ref   : (1, TM)        P(action = 1) per batch element (lane-dense)
    xT = xT_ref[...]
    w1T = w1T_ref[...]

    # fc_1 on the VPU: K=4 unrolled broadcast multiply-adds.
    #   h[j, b] = b1[j] + sum_k w1[k, j] * x[b, k]
    h = b1c_ref[...] + w1T[:, 0:1] * xT[0:1, :]
    for k in range(1, w1T.shape[1]):
        h = h + w1T[:, k:k + 1] * xT[k:k + 1, :]

    # dropout (eval mode) -> identity, then ReLU.
    h = jnp.maximum(h, 0.0)

    # Collapsed fc_2 + 2-class softmax:
    #   d = l1 - l0 = sum_j h[j, b] * wdiff[j] + bdiff
    #   p1 = sigmoid(d), p0 = 1 - p1  (p0 reconstructed in the wrapper)
    d = jnp.sum(h * wdc_ref[...], axis=0, keepdims=True) + bdiff_ref[...]  # (1, TM)
    p1_ref[...] = pl.reciprocal(1.0 + jnp.exp(-d), approx=True)            # EUP exp + rcp


def _default_tm(B):
    """Batch tile (lane width per grid step).

    Single step unless the batch is a multiple of 128; then pick a multiple of
    128 that divides B, is <= 1024, and gives >= 2 grid steps (so the parallel
    batch axis can shard across v7x's two TensorCores)."""
    if B <= 128 or B % 128 != 0:
        return B
    tm = min(1024, max(128, (B // 2) // 128 * 128))
    while B % tm != 0:
        tm -= 128
    return max(tm, 128)


@partial(jax.jit, static_argnames=("tm",))
def policy_forward(x, w1, b1, w2, b2, *, tm=None):
    B = x.shape[0]

    # Derived parameters — tiny ops fused into this single jitted executable.
    xT = x.T                                           # (IN_DIM, B)
    w1T = w1.T                                         # (HIDDEN, IN_DIM)
    b1c = b1.reshape(-1, 1)                            # (HIDDEN, 1)
    wdc = (w2[:, 1] - w2[:, 0]).reshape(-1, 1)         # (HIDDEN, 1)
    bdiff = (b2[0, 1] - b2[0, 0]).reshape(1, 1)        # (1, 1)

    if tm is None:
        tm = _default_tm(B)
    assert B % tm == 0, "batch must be a multiple of the batch tile"
    assert tm == B or tm % 128 == 0, "batch tile must be lane-dense (mult of 128) or the full batch"
    grid = (B // tm,)

    p1_row = pl.pallas_call(
        policy_kernel,
        out_shape=jax.ShapeDtypeStruct((1, B), jnp.float32),
        grid_spec=pltpu.PrefetchScalarGridSpec(
            num_scalar_prefetch=0,
            grid=grid,
            in_specs=[
                pl.BlockSpec((IN_DIM, tm), lambda i: (0, i)),   # x^T: tiled over batch (lanes)
                pl.BlockSpec((HIDDEN, IN_DIM), lambda i: (0, 0)),  # weights resident
                pl.BlockSpec((HIDDEN, 1), lambda i: (0, 0)),
                pl.BlockSpec((HIDDEN, 1), lambda i: (0, 0)),
                pl.BlockSpec((1, 1), lambda i: (0, 0)),
            ],
            out_specs=pl.BlockSpec((1, tm), lambda i: (0, i)),  # lane-dense p1 row
        ),
        compiler_params=pltpu.CompilerParams(
            dimension_semantics=("parallel",)),   # shards batch across TCs on v7x
    )(xT, w1T, b1c, wdc, bdiff)

    p1 = p1_row.reshape(B, 1)
    p0 = 1.0 - p1
    return jnp.concatenate([p0, p1], axis=1)       # (B, 2) class probabilities


def init_params(key):
    """Deterministic init mimicking PyTorch nn.Linear defaults:
    U(-1/sqrt(fan_in), 1/sqrt(fan_in)) for both weight and bias.
    Weights stored as (in_features, out_features) so forward is x @ W + b."""
    k1, k2, k3, k4 = jax.random.split(key, 4)
    bound1 = 1.0 / jnp.sqrt(float(IN_DIM))
    w1 = jax.random.uniform(k1, (IN_DIM, HIDDEN), jnp.float32, -bound1, bound1)
    b1 = jax.random.uniform(k2, (1, HIDDEN), jnp.float32, -bound1, bound1)
    bound2 = 1.0 / jnp.sqrt(float(HIDDEN))
    w2 = jax.random.uniform(k3, (HIDDEN, 2), jnp.float32, -bound2, bound2)
    b2 = jax.random.uniform(k4, (1, 2), jnp.float32, -bound2, bound2)
    return w1, b1, w2, b2


if __name__ == "__main__":
    key = jax.random.PRNGKey(0)
    k_params, k_x = jax.random.split(key)
    w1, b1, w2, b2 = init_params(k_params)

    # Small batch of CartPole-like states: (batch=8, state_dim=4)
    x = jax.random.normal(k_x, (8, 4), jnp.float32)

    out = policy_forward(x, w1, b1, w2, b2)
    out = jax.block_until_ready(out)

    # Reference in plain JAX (same math, dropout = identity in eval mode).
    h_ref = jnp.maximum(x @ w1 + b1, 0.0)
    ref = jax.nn.softmax(h_ref @ w2 + b2, axis=1)

    assert out.shape == (8, 2)
    # Slightly loose atol: the kernel uses the EUP approximate reciprocal.
    assert jnp.allclose(out, ref, atol=2e-3, rtol=0.0)
    assert jnp.allclose(jnp.sum(out, axis=1), 1.0, atol=1e-6)

    print("KERNEL_OK")
</pallas_src>

<mosaic_0001>
module attributes {stable_mosaic.version = 11 : i64} {
  func.func @policy_kernel(%arg0: i32, %arg1: memref<4x8xf32, #tpu.memory_space<vmem>>, %arg2: memref<128x4xf32, #tpu.memory_space<vmem>>, %arg3: memref<128x1xf32, #tpu.memory_space<vmem>>, %arg4: memref<128x1xf32, #tpu.memory_space<vmem>>, %arg5: memref<1x1xf32, #tpu.memory_space<vmem>>, %arg6: memref<1x8xf32, #tpu.memory_space<vmem>>) attributes {dimension_semantics = [#tpu.dimension_semantics<parallel>], iteration_bounds = array<i64: 1>, scalar_prefetch = 0 : i64, scratch_operands = 0 : i64, tpu.core_type = #tpu.core_type<tc>, window_params = [{transform_indices = @transform_0, window_bounds = array<i64: 4, 8>}, {pipeline_mode = #tpu.pipeline_mode<synchronous>, transform_indices = @transform_1, window_bounds = array<i64: 128, 4>}, {pipeline_mode = #tpu.pipeline_mode<synchronous>, transform_indices = @transform_2, window_bounds = array<i64: 128, 1>}, {pipeline_mode = #tpu.pipeline_mode<synchronous>, transform_indices = @transform_3, window_bounds = array<i64: 128, 1>}, {pipeline_mode = #tpu.pipeline_mode<synchronous>, transform_indices = @transform_4, window_bounds = array<i64: 1, 1>}, {transform_indices = @transform_5, window_bounds = array<i64: 1, 8>}]} {
    %c0 = arith.constant 0 : index
    %c0_0 = arith.constant 0 : index
    %0 = vector.load %arg1[%c0, %c0_0] : memref<4x8xf32, #tpu.memory_space<vmem>>, vector<4x8xf32>
    %c0_1 = arith.constant 0 : index
    %c0_2 = arith.constant 0 : index
    %1 = vector.load %arg2[%c0_1, %c0_2] : memref<128x4xf32, #tpu.memory_space<vmem>>, vector<128x4xf32>
    %c0_3 = arith.constant 0 : index
    %c0_4 = arith.constant 0 : index
    %2 = vector.load %arg3[%c0_3, %c0_4] : memref<128x1xf32, #tpu.memory_space<vmem>>, vector<128x1xf32>
    %3 = vector.extract_strided_slice %1 {offsets = [0, 0], sizes = [128, 1], strides = [1, 1]} : vector<128x4xf32> to vector<128x1xf32>
    %4 = vector.extract_strided_slice %0 {offsets = [0, 0], sizes = [1, 8], strides = [1, 1]} : vector<4x8xf32> to vector<1x8xf32>
    %5 = vector.broadcast %3 : vector<128x1xf32> to vector<128x8xf32>
    %6 = vector.broadcast %4 : vector<1x8xf32> to vector<128x8xf32>
    %7 = arith.mulf %5, %6 : vector<128x8xf32>
    %8 = vector.broadcast %2 : vector<128x1xf32> to vector<128x8xf32>
    %9 = arith.addf %8, %7 : vector<128x8xf32>
    %10 = vector.extract_strided_slice %1 {offsets = [0, 1], sizes = [128, 1], strides = [1, 1]} : vector<128x4xf32> to vector<128x1xf32>
    %11 = vector.extract_strided_slice %0 {offsets = [1, 0], sizes = [1, 8], strides = [1, 1]} : vector<4x8xf32> to vector<1x8xf32>
    %12 = vector.broadcast %10 : vector<128x1xf32> to vector<128x8xf32>
    %13 = vector.broadcast %11 : vector<1x8xf32> to vector<128x8xf32>
    %14 = arith.mulf %12, %13 : vector<128x8xf32>
    %15 = arith.addf %9, %14 : vector<128x8xf32>
    %16 = vector.extract_strided_slice %1 {offsets = [0, 2], sizes = [128, 1], strides = [1, 1]} : vector<128x4xf32> to vector<128x1xf32>
    %17 = vector.extract_strided_slice %0 {offsets = [2, 0], sizes = [1, 8], strides = [1, 1]} : vector<4x8xf32> to vector<1x8xf32>
    %18 = vector.broadcast %16 : vector<128x1xf32> to vector<128x8xf32>
    %19 = vector.broadcast %17 : vector<1x8xf32> to vector<128x8xf32>
    %20 = arith.mulf %18, %19 : vector<128x8xf32>
    %21 = arith.addf %15, %20 : vector<128x8xf32>
    %22 = vector.extract_strided_slice %1 {offsets = [0, 3], sizes = [128, 1], strides = [1, 1]} : vector<128x4xf32> to vector<128x1xf32>
    %23 = vector.extract_strided_slice %0 {offsets = [3, 0], sizes = [1, 8], strides = [1, 1]} : vector<4x8xf32> to vector<1x8xf32>
    %24 = vector.broadcast %22 : vector<128x1xf32> to vector<128x8xf32>
    %25 = vector.broadcast %23 : vector<1x8xf32> to vector<128x8xf32>
    %26 = arith.mulf %24, %25 : vector<128x8xf32>
    %27 = arith.addf %21, %26 : vector<128x8xf32>
    %cst = arith.constant 0.000000e+00 : f32
    %28 = vector.broadcast %cst : f32 to vector<128x8xf32>
    %29 = arith.maximumf %27, %28 : vector<128x8xf32>
    %c0_5 = arith.constant 0 : index
    %c0_6 = arith.constant 0 : index
    %30 = vector.load %arg4[%c0_5, %c0_6] : memref<128x1xf32, #tpu.memory_space<vmem>>, vector<128x1xf32>
    %31 = vector.broadcast %30 : vector<128x1xf32> to vector<128x8xf32>
    %32 = arith.mulf %29, %31 : vector<128x8xf32>
    %cst_7 = arith.constant dense<0.000000e+00> : vector<8xf32>
    %33 = vector.multi_reduction <add>, %32, %cst_7 [0] : vector<128x8xf32> to vector<8xf32>
    %34 = vector.shape_cast %33 : vector<8xf32> to vector<1x8xf32>
    %c0_8 = arith.constant 0 : index
    %c0_9 = arith.constant 0 : index
    %35 = vector.load %arg5[%c0_8, %c0_9] : memref<1x1xf32, #tpu.memory_space<vmem>>, vector<1x1xf32>
    %36 = vector.broadcast %35 : vector<1x1xf32> to vector<1x8xf32>
    %37 = arith.addf %34, %36 : vector<1x8xf32>
    %cst_10 = arith.constant 0.000000e+00 : f32
    %38 = vector.broadcast %cst_10 : f32 to vector<1x8xf32>
    %39 = arith.subf %38, %37 : vector<1x8xf32>
    %40 = math.exp %39 : vector<1x8xf32>
    %cst_11 = arith.constant 1.000000e+00 : f32
    %41 = vector.broadcast %cst_11 : f32 to vector<1x8xf32>
    %42 = arith.addf %41, %40 : vector<1x8xf32>
    %43 = tpu.reciprocal %42 {approx = true} : vector<1x8xf32> -> vector<1x8xf32>
    %c0_12 = arith.constant 0 : index
    %c0_13 = arith.constant 0 : index
    %44 = vector.load %arg6[%c0_12, %c0_13] : memref<1x8xf32, #tpu.memory_space<vmem>>, vector<1x8xf32>
    tpu.vector_store %arg6[%c0_12, %c0_13], %43 {strides = array<i32>} : memref<1x8xf32, #tpu.memory_space<vmem>>, vector<1x8xf32>,
    return
  }
  func.func @transform_0(%arg0: i32) -> (i32, i32) {
    %c0_i32 = arith.constant 0 : i32
    %c0_i32_0 = arith.constant 0 : i32
    return %c0_i32, %arg0 : i32, i32
  }
  func.func @transform_1(%arg0: i32) -> (i32, i32) {
    %c0_i32 = arith.constant 0 : i32
    %c0_i32_0 = arith.constant 0 : i32
    %c0_i32_1 = arith.constant 0 : i32
    return %c0_i32, %c0_i32_0 : i32, i32
  }
  func.func @transform_2(%arg0: i32) -> (i32, i32) {
    %c0_i32 = arith.constant 0 : i32
    %c0_i32_0 = arith.constant 0 : i32
    %c0_i32_1 = arith.constant 0 : i32
    return %c0_i32, %c0_i32_0 : i32, i32
  }
  func.func @transform_3(%arg0: i32) -> (i32, i32) {
    %c0_i32 = arith.constant 0 : i32
    %c0_i32_0 = arith.constant 0 : i32
    %c0_i32_1 = arith.constant 0 : i32
    return %c0_i32, %c0_i32_0 : i32, i32
  }
  func.func @transform_4(%arg0: i32) -> (i32, i32) {
    %c0_i32 = arith.constant 0 : i32
    %c0_i32_0 = arith.constant 0 : i32
    %c0_i32_1 = arith.constant 0 : i32
    return %c0_i32, %c0_i32_0 : i32, i32
  }
  func.func @transform_5(%arg0: i32) -> (i32, i32) {
    %c0_i32 = arith.constant 0 : i32
    %c0_i32_0 = arith.constant 0 : i32
    return %c0_i32, %arg0 : i32, i32
  }
}

</mosaic_0001>

<bundles_post_ra>
// kernel: policy_forward.1
= control target key start
LH: loop header
LB: loop body
LE: loop exit
PB: predicated region body
PF: predicated region fallthrough
CT: control target
= control target key end

     0   :  { %v769_v0 = vmov 1   ;;  %v770_v1 = vmov 0   ;;  %v771_v36 = vmov 2   ;;  %v772_v37 = vmov 3   ;;  %s1284_s1 = inlined_call_operand.vmem [shape: f32[128,4], index: 1, kind: input, shape index: {}]   ;;  %s1285_s2 = inlined_call_operand.vmem [shape: f32[128,1], index: 2, kind: input, shape index: {}]   ;;  %s1286_s4 = inlined_call_operand.<no memory space> [shape: f32[1,1], index: 4, kind: input, shape index: {}]   ;;  %s1287_s3 = inlined_call_operand.vmem [shape: f32[128,1], index: 3, kind: input, shape index: {}]   ;;  %s1288_s0 = inlined_call_operand.vmem [shape: f32[4,8], index: 0, kind: input, shape index: {}]   ;;  %s1289_s5 = inlined_call_operand.vmem [shape: f32[1,8], index: 5, kind: output, shape index: {}]  }
   0x1   :  { %744 = vset.pattern.permute.xlu0 %v769_v0  ;;  %743 = vset.pattern.permute.xlu1 %v770_v1  ;;  %v807_v2 = vld [vmem:[%s1284_s1 + $0x10] sm:$0xff]  ;;  %v812_v3 = vld [vmem:[%s1284_s1] sm:$0xff]  ;;  %v819_v4 = vld [vmem:[%s1284_s1 + $0x18] sm:$0xff]  ;;  %v10_v27 = vstv %s1286_s4  ;;  %v135_v52 = vlaneseq  ;;  %vm679_vm0 = vcmask 64512   ;;  %vm733_vm1 = vcmask 57344  }
   0x2   :  { %67 = vperm.xlu1 %743, %v807_v2   ;;  %252 = vperm.xlu0 %744, %v812_v3   ;;  %v826_v5 = vld [vmem:[%s1284_s1 + $0x28] sm:$0xff]  ;;  %v833_v6 = vld [vmem:[%s1284_s1 + $0x38] sm:$0xff]  ;;  %v885_v15 = vld [vmem:[%s1284_s1 + $0x20] sm:$0xff]  ;;  %11 = vst [vmem:[#allocation2] sm:$0x1] %v10_v27 }
   0x3   :  { %v840_v7 = vld [vmem:[%s1284_s1 + $0x48] sm:$0xff]  ;;  %v847_v8 = vld [vmem:[%s1284_s1 + $0x58] sm:$0xff]  ;;  %v894_v17 = vld [vmem:[%s1284_s1 + $0x30] sm:$0xff]  ;;  %v1032_v57 = vshrl.u32 %v135_v52, 7 }
   0x4   :  { %v854_v9 = vld [vmem:[%s1284_s1 + $0x68] sm:$0xff]  ;;  %v861_v10 = vld [vmem:[%s1284_s1 + $0x78] sm:$0xff]  ;;  %v903_v19 = vld [vmem:[%s1284_s1 + $0x40] sm:$0xff] }
   0x5   :  { %v40_v11 = vld [vmem:[%s1285_s2 + $0x8] sm:$0xff]  ;;  %v42_v12 = vld [vmem:[%s1285_s2 + $0x18] sm:$0xff]  ;;  %v912_v21 = vld [vmem:[%s1284_s1 + $0x50] sm:$0xff]  ;;  %v317_v59 = vsub.s32 1, %v1032_v57  ;;  %v137_v62 = vsub.s32 0, %v1032_v57 }
   0x6   :  { %72 = vperm.xlu1 %743, %v819_v4   ;;  %264 = vperm.xlu0 %744, %v819_v4   ;;  %v876_v13 = vld [vmem:[%s1284_s1 + $0x8] sm:$0xff]  ;;  %v46_v16 = vld [vmem:[%s1285_s2 + $0x38] sm:$0xff]  ;;  %v921_v23 = vld [vmem:[%s1284_s1 + $0x60] sm:$0xff] }
   0x7   :  { %v44_v14 = vld [vmem:[%s1285_s2 + $0x28] sm:$0xff]  ;;  %v50_v20 = vld [vmem:[%s1285_s2 + $0x58] sm:$0xff]  ;;  %v930_v25 = vld [vmem:[%s1284_s1 + $0x70] sm:$0xff] }
   0x8   :  { %v48_v18 = vld [vmem:[%s1285_s2 + $0x48] sm:$0xff]  ;;  %v54_v24 = vld [vmem:[%s1285_s2 + $0x78] sm:$0xff]  ;;  %v39_v26 = vld [vmem:[%s1285_s2] sm:$0xff] }
   0x9   :  { %v52_v22 = vld [vmem:[%s1285_s2 + $0x68] sm:$0xff]  ;;  %v41_v28 = vld [vmem:[%s1285_s2 + $0x10] sm:$0xff]  ;;  %v43_v29 = vld [vmem:[%s1285_s2 + $0x20] sm:$0xff] }
   0xa   :  { %82 = vperm.xlu1 %743, %v826_v5   ;;  %272 = vperm.xlu0 %744, %v826_v5   ;;  %v45_v30 = vld [vmem:[%s1285_s2 + $0x30] sm:$0xff]  ;;  %v47_v31 = vld [vmem:[%s1285_s2 + $0x40] sm:$0xff]  ;;  %v568_v35 = vld [vmem:[%s1287_s3 + $0x8] sm:$0xff] }
   0xb   :  { %v49_v32 = vld [vmem:[%s1285_s2 + $0x50] sm:$0xff]  ;;  %v51_v33 = vld [vmem:[%s1285_s2 + $0x60] sm:$0xff]  ;;  %v570_v56 = vld [vmem:[%s1287_s3 + $0x18] sm:$0xff] }
   0xc   :  { %v53_v34 = vld [vmem:[%s1285_s2 + $0x70] sm:$0xff]  ;;  %v567_v44 = vld [vmem:[%s1287_s3] sm:$0xff]  ;;  %v574_v58 = vld [vmem:[%s1287_s3 + $0x38] sm:$0xff] }
   0xd   :  { %v569_v51 = vld [vmem:[%s1287_s3 + $0x10] sm:$0xff]  ;;  %v571_v53 = vld [vmem:[%s1287_s3 + $0x20] sm:$0xff] }
   0xe   :  { %92 = vperm.xlu1 %743, %v833_v6   ;;  %280 = vperm.xlu0 %744, %v833_v6   ;;  %v1046_v63 = vld [vmem:[%s1288_s0] sm:$0xf] }
  0x12   :  { %102 = vperm.xlu1 %743, %v840_v7   ;;  %288 = vperm.xlu0 %744, %v840_v7  }
  0x16   :  { %112 = vperm.xlu1 %743, %v847_v8   ;;  %296 = vperm.xlu0 %744, %v847_v8  }
  0x1a   :  { %122 = vperm.xlu1 %743, %v854_v9   ;;  %304 = vperm.xlu0 %744, %v854_v9  }
  0x1e   :  { %132 = vperm.xlu1 %743, %v861_v10   ;;  %312 = vperm.xlu0 %744, %v861_v10  }
  0x22   :  { %162 = vperm.xlu1 %743, %v40_v11   ;;  %746 = vset.pattern.permute.xlu0 %v770_v1 }
  0x23   :  { %57 = vperm.xlu0 %746, %v812_v3  }
  0x26   :  { %172 = vperm.xlu1 %743, %v42_v12  }
  0x27   :  { %62 = vperm.xlu0 %746, %v876_v13  }
  0x2a   :  { %182 = vperm.xlu1 %743, %v44_v14  }
  0x2b   :  { %77 = vperm.xlu0 %746, %v885_v15  }
  0x2e   :  { %192 = vperm.xlu1 %743, %v46_v16   ;;  %v572_v16 = vld [vmem:[%s1287_s3 + $0x28] sm:$0xff] }
  0x2f   :  { %87 = vperm.xlu0 %746, %v894_v17  }
  0x32   :  { %202 = vperm.xlu1 %743, %v48_v18  }
  0x33   :  { %97 = vperm.xlu0 %746, %v903_v19  }
  0x36   :  { %212 = vperm.xlu1 %743, %v50_v20  }
  0x37   :  { %107 = vperm.xlu0 %746, %v912_v21  }
  0x3a   :  { %222 = vperm.xlu1 %743, %v52_v22  }
  0x3b   :  { %117 = vperm.xlu0 %746, %v921_v23  }
  0x3e   :  { %232 = vperm.xlu1 %743, %v54_v24  }
  0x3f   :  { %127 = vperm.xlu0 %746, %v930_v25  }
  0x42   :  { %745 = vset.pattern.permute.xlu1 %v769_v0  ;;  %v577_v0 = vld [vmem:[%s1287_s3 + $0x50] sm:$0xff] }
  0x43   :  { %256 = vperm.xlu1 %745, %v876_v13   ;;  %157 = vperm.xlu0 %746, %v39_v26  }
  0x47   :  { %260 = vperm.xlu1 %745, %v807_v2   ;;  %167 = vperm.xlu0 %746, %v41_v28   ;;  %v573_v28 = vld [vmem:[%s1287_s3 + $0x30] sm:$0xff] }
  0x4b   :  { %268 = vperm.xlu1 %745, %v885_v15   ;;  %177 = vperm.xlu0 %746, %v43_v29   ;;  %v581_v29 = vld [vmem:[%s1287_s3 + $0x70] sm:$0xff] }
  0x4f   :  { %276 = vperm.xlu1 %745, %v894_v17   ;;  %187 = vperm.xlu0 %746, %v45_v30  }
  0x53   :  { %284 = vperm.xlu1 %745, %v903_v19   ;;  %197 = vperm.xlu0 %746, %v47_v31  }
  0x57   :  { %292 = vperm.xlu1 %745, %v912_v21   ;;  %207 = vperm.xlu0 %746, %v49_v32  }
  0x5b   :  { %300 = vperm.xlu1 %745, %v921_v23   ;;  %217 = vperm.xlu0 %746, %v51_v33  }
  0x5f   :  { %308 = vperm.xlu1 %745, %v930_v25   ;;  %227 = vperm.xlu0 %746, %v53_v34  }
  0x63   :  { %747 = vset.pattern.permute.xlu1 %v771_v36  ;;  %590 = vperm.xlu0 %746, %v568_v35  }
  0x64   :  { %352 = vperm.xlu1 %747, %v812_v3  }
  0x67   :  { %750 = vset.pattern.permute.xlu0 %v772_v37 }
  0x68   :  { %360 = vperm.xlu1 %747, %v807_v2   ;;  %456 = vperm.xlu0 %750, %v876_v13  }
  0x6c   :  { %364 = vperm.xlu1 %747, %v819_v4   ;;  %468 = vperm.xlu0 %750, %v885_v15  }
  0x70   :  { %372 = vperm.xlu1 %747, %v826_v5   ;;  %476 = vperm.xlu0 %750, %v894_v17  }
  0x74   :  { %380 = vperm.xlu1 %747, %v833_v6   ;;  %488 = vperm.xlu0 %750, %v840_v7  }
  0x78   :  { %388 = vperm.xlu1 %747, %v840_v7   ;;  %755 = vset.pattern.permute.xlu0 %v771_v36  ;;  %v578_v7 = vld [vmem:[%s1287_s3 + $0x58] sm:$0xff] }
  0x79   :  { %356 = vperm.xlu0 %755, %v876_v13  }
  0x7c   :  { %396 = vperm.xlu1 %747, %v847_v8  }
  0x7d   :  { %368 = vperm.xlu0 %755, %v885_v15  }
  0x80   :  { %748 = vset.pattern.permute.xlu1 %v772_v37 }
  0x81   :  { %v988_v38 = vpop.permute.xlu1 %67  ;;  %452 = vperm.xlu1 %748, %v812_v3   ;;  %376 = vperm.xlu0 %755, %v894_v17   ;;  %v992_v39 = vpop.permute.xlu0 %252  ;;  %v579_v17 = vld [vmem:[%s1287_s3 + $0x60] sm:$0xff] }
  0x85   :  { %v73_v40 = vpop.permute.xlu1 %72  ;;  %460 = vperm.xlu1 %748, %v807_v2   ;;  %384 = vperm.xlu0 %755, %v903_v19   ;;  %v265_v41 = vpop.permute.xlu0 %264  ;;  %v1052_v2 = vrot.slane %v1046_v63, %v317_v59 }
  0x87   :  { %v322_v12 = vmul.f32 %v1052_v2, %v265_v41 }
  0x89   :  { %v83_v42 = vpop.permute.xlu1 %82  ;;  %464 = vperm.xlu1 %748, %v819_v4   ;;  %392 = vperm.xlu0 %755, %v912_v21   ;;  %v273_v43 = vpop.permute.xlu0 %272  ;;  %v1059_v4 = vrot.slane %v1046_v63, %v137_v62 }
  0x8a   :  { %v324_v20 = vmul.f32 %v1052_v2, %v273_v43 }
  0x8b   :  { %v142_v11 = vmul.f32 %v1059_v4, %v73_v40  ;;  %v144_v18 = vmul.f32 %v1059_v4, %v83_v42  ;;  %v717_v40 = vld [vmem:[#allocation2] sm:$0x1] }
  0x8d   :  { %v1001_v45 = vpop.permute.xlu1 %92  ;;  %749 = vset.pattern.permute.xlu1 %v770_v1  ;;  %400 = vperm.xlu0 %755, %v921_v23   ;;  %v281_v46 = vpop.permute.xlu0 %280 }
  0x8e   :  { %585 = vperm.xlu1 %749, %v567_v44   ;;  %v146_v30 = vmul.f32 %v1059_v4, %v1001_v45  ;;  %v326_v31 = vmul.f32 %v1052_v2, %v281_v46 }
  0x91   :  { %v1005_v47 = vpop.permute.xlu1 %102  ;;  %404 = vperm.xlu0 %755, %v854_v9   ;;  %v1008_v48 = vpop.permute.xlu0 %288 }
  0x92   :  { %751 = vset.pattern.permute.xlu1 %v772_v37  ;;  %v148_v41 = vmul.f32 %v1059_v4, %v1005_v47  ;;  %v328_v42 = vmul.f32 %v1052_v2, %v1008_v48 }
  0x93   :  { %472 = vperm.xlu1 %751, %v826_v5  }
  0x95   :  { %v1012_v49 = vpop.permute.xlu1 %112  ;;  %408 = vperm.xlu0 %755, %v930_v25   ;;  %v1015_v50 = vpop.permute.xlu0 %296 }
  0x96   :  { %v330_v47 = vmul.f32 %v1052_v2, %v1015_v50 }
  0x97   :  { %752 = vset.pattern.permute.xlu1 %v770_v1 }
  0x98   :  { %595 = vperm.xlu1 %752, %v569_v51   ;;  %v150_v51 = vmul.f32 %v1059_v4, %v1012_v49 }
  0x99   :  { %v1024_v54 = vpop.permute.xlu1 %122  ;;  %760 = vset.pattern.permute.xlu0 %v770_v1  ;;  %v1027_v55 = vpop.permute.xlu0 %304 }
  0x9a   :  { %605 = vperm.xlu0 %760, %v571_v53   ;;  %v332_v49 = vmul.f32 %v1052_v2, %v1027_v55 }
  0x9c   :  { %600 = vperm.xlu1 %752, %v570_v56  }
  0x9d   :  { %v1038_v60 = vpop.permute.xlu1 %132  ;;  %v1040_v61 = vpop.permute.xlu0 %312 }
  0x9e   :  { %620 = vperm.xlu0 %760, %v574_v58   ;;  %v152_v58 = vmul.f32 %v1059_v4, %v1024_v54 }
  0xa0   :  { %753 = vset.pattern.permute.xlu1 %v772_v37 }
  0xa1   :  { %v163_v3 = vpop.permute.xlu1 %162  ;;  %480 = vperm.xlu1 %753, %v833_v6  }
  0xa2   :  { %v1061_v5 = vpop.permute.xlu0 %57  ;;  %635 = vperm.xlu0 %760, %v577_v0  }
  0xa5   :  { %v173_v13 = vpop.permute.xlu1 %172  ;;  %484 = vperm.xlu1 %753, %v903_v19  }
  0xa6   :  { %v238_v6 = vadd.f32 %v173_v13, %v142_v11  ;;  %v63_v14 = vpop.permute.xlu0 %62  ;;  %640 = vperm.xlu0 %760, %v578_v7   ;;  %v334_v11 = vmul.f32 %v1052_v2, %v1040_v61  ;;  %v576_v61 = vld [vmem:[%s1287_s3 + $0x48] sm:$0xff] }
  0xa7   :  { %v140_v15 = vmul.f32 %v1059_v4, %v63_v14 }
  0xa8   :  { %v1078_v22 = vadd.f32 %v322_v12, %v238_v6  ;;  %v139_v6 = vmul.f32 %v1059_v4, %v1061_v5  ;;  %v141_v5 = vmul.f32 %v1059_v4, %v988_v38 }
  0xa9   :  { %v236_v19 = vadd.f32 %v163_v3, %v140_v15  ;;  %v183_v24 = vpop.permute.xlu1 %182  ;;  %754 = vset.pattern.permute.xlu1 %v770_v1  ;;  %v319_v15 = vmul.f32 %v1052_v2, %v992_v39 }
  0xaa   :  { %v240_v26 = vadd.f32 %v183_v24, %v144_v18  ;;  %610 = vperm.xlu1 %754, %v572_v16   ;;  %v78_v27 = vpop.permute.xlu0 %77  ;;  %645 = vperm.xlu0 %760, %v579_v17  }
  0xab   :  { %v143_v39 = vmul.f32 %v1059_v4, %v78_v27 }
  0xac   :  { %v1090_v32 = vadd.f32 %v324_v20, %v240_v26 }
  0xad   :  { %v193_v33 = vpop.permute.xlu1 %192 }
  0xae   :  { %v242_v34 = vadd.f32 %v193_v33, %v146_v30  ;;  %615 = vperm.xlu1 %754, %v573_v28   ;;  %v88_v35 = vpop.permute.xlu0 %87  ;;  %655 = vperm.xlu0 %760, %v581_v29  }
  0xaf   :  { %v145_v38 = vmul.f32 %v1059_v4, %v88_v35 }
  0xb0   :  { %v1096_v43 = vadd.f32 %v326_v31, %v242_v34 }
  0xb1   :  { %v203_v44 = vpop.permute.xlu1 %202 }
  0xb2   :  { %v244_v45 = vadd.f32 %v203_v44, %v148_v41  ;;  %756 = vset.pattern.permute.xlu1 %v772_v37  ;;  %v98_v46 = vpop.permute.xlu0 %97  ;;  %720 = vperm.xlu0 %760, %v717_v40  }
  0xb3   :  { %492 = vperm.xlu1 %756, %v912_v21   ;;  %v575_v21 = vld [vmem:[%s1287_s3 + $0x40] sm:$0xff]  ;;  %v147_v27 = vmul.f32 %v1059_v4, %v98_v46 }
  0xb4   :  { %v1102_v52 = vadd.f32 %v328_v42, %v244_v45 }
  0xb5   :  { %v213_v53 = vpop.permute.xlu1 %212 }
  0xb6   :  { %v246_v48 = vadd.f32 %v213_v53, %v150_v51  ;;  %v108_v56 = vpop.permute.xlu0 %107 }
  0xb7   :  { %496 = vperm.xlu1 %756, %v847_v8   ;;  %v154_v8 = vmul.f32 %v1059_v4, %v1038_v60  ;;  %v149_v53 = vmul.f32 %v1059_v4, %v108_v56 }
  0xb8   :  { %v1109_v59 = vadd.f32 %v330_v47, %v246_v48 }
  0xb9   :  { %v223_v0 = vpop.permute.xlu1 %222 }
  0xba   :  { %v248_v3 = vadd.f32 %v223_v0, %v152_v58  ;;  %v118_v7 = vpop.permute.xlu0 %117 }
  0xbb   :  { %757 = vset.pattern.permute.xlu1 %v770_v1 }
  0xbc   :  { %v1119_v50 = vadd.f32 %v332_v49, %v248_v3  ;;  %625 = vperm.xlu1 %757, %v575_v21   ;;  %v151_v21 = vmul.f32 %v1059_v4, %v118_v7 }
  0xbd   :  { %v233_v54 = vpop.permute.xlu1 %232 }
  0xbe   :  { %v250_v12 = vadd.f32 %v233_v54, %v154_v8  ;;  %v128_v13 = vpop.permute.xlu0 %127  ;;  %v417_v54 = vsub.s32 2, %v1032_v57 }
  0xc0   :  { %v1125_v55 = vadd.f32 %v334_v11, %v250_v12  ;;  %758 = vset.pattern.permute.xlu1 %v772_v37  ;;  %v153_v11 = vmul.f32 %v1059_v4, %v128_v13 }
  0xc1   :  { %500 = vperm.xlu1 %758, %v921_v23  }
  0xc2   :  { %v257_v14 = vpop.permute.xlu1 %256  ;;  %v158_v60 = vpop.permute.xlu0 %157 }
  0xc3   :  { %v320_v16 = vmul.f32 %v1052_v2, %v257_v14  ;;  %v235_v17 = vadd.f32 %v158_v60, %v139_v6  ;;  %v582_v60 = vld [vmem:[%s1287_s3 + $0x78] sm:$0xff] }
  0xc5   :  { %v1137_v18 = vadd.f32 %v320_v16, %v236_v19  ;;  %v335_v20 = vadd.f32 %v319_v15, %v235_v17  ;;  %759 = vset.pattern.permute.xlu1 %v770_v1  ;;  %v1179_v15 = vrot.slane %v1046_v63, %v417_v54 }
  0xc6   :  { %v261_v23 = vpop.permute.xlu1 %260  ;;  %630 = vperm.xlu1 %759, %v576_v61   ;;  %v168_v24 = vpop.permute.xlu0 %167 }
  0xc7   :  { %v321_v26 = vmul.f32 %v1052_v2, %v261_v23  ;;  %v237_v28 = vadd.f32 %v168_v24, %v141_v5 }
  0xc9   :  { %v337_v29 = vadd.f32 %v321_v26, %v237_v28 }
  0xca   :  { %v269_v30 = vpop.permute.xlu1 %268  ;;  %761 = vset.pattern.permute.xlu1 %v772_v37  ;;  %v178_v31 = vpop.permute.xlu0 %177 }
  0xcb   :  { %v323_v19 = vmul.f32 %v1052_v2, %v269_v30  ;;  %v239_v33 = vadd.f32 %v178_v31, %v143_v39  ;;  %504 = vperm.xlu1 %761, %v854_v9  }
  0xcd   :  { %v1146_v34 = vadd.f32 %v323_v19, %v239_v33 }
  0xce   :  { %v277_v40 = vpop.permute.xlu1 %276  ;;  %v188_v41 = vpop.permute.xlu0 %187 }
  0xcf   :  { %v325_v42 = vmul.f32 %v1052_v2, %v277_v40  ;;  %v241_v44 = vadd.f32 %v188_v41, %v145_v38  ;;  %762 = vset.pattern.permute.xlu1 %v771_v36 }
  0xd0   :  { %412 = vperm.xlu1 %762, %v861_v10  }
  0xd1   :  { %v1152_v45 = vadd.f32 %v325_v42, %v241_v44 }
  0xd2   :  { %v285_v35 = vpop.permute.xlu1 %284  ;;  %v198_v51 = vpop.permute.xlu0 %197 }
  0xd3   :  { %v327_v9 = vmul.f32 %v1052_v2, %v285_v35  ;;  %v243_v47 = vadd.f32 %v198_v51, %v147_v27  ;;  %v517_v27 = vsub.s32 3, %v1032_v57 }
  0xd4   :  { %763 = vset.pattern.permute.xlu1 %v772_v37 }
  0xd5   :  { %v1157_v48 = vadd.f32 %v327_v9, %v243_v47  ;;  %508 = vperm.xlu1 %763, %v930_v25   ;;  %v580_v25 = vld [vmem:[%s1287_s3 + $0x68] sm:$0xff] }
  0xd6   :  { %v293_v46 = vpop.permute.xlu1 %292  ;;  %v208_v58 = vpop.permute.xlu0 %207 }
  0xd7   :  { %v329_v36 = vmul.f32 %v1052_v2, %v293_v46  ;;  %v245_v0 = vadd.f32 %v208_v58, %v149_v53 }
  0xd9   :  { %v1162_v49 = vadd.f32 %v329_v36, %v245_v0  ;;  %512 = vperm.xlu1 %763, %v861_v10  }
  0xda   :  { %v301_v56 = vpop.permute.xlu1 %300  ;;  %v218_v3 = vpop.permute.xlu0 %217 }
  0xdb   :  { %v331_v8 = vmul.f32 %v1052_v2, %v301_v56  ;;  %v247_v37 = vadd.f32 %v218_v3, %v151_v21 }
  0xdd   :  { %v1171_v12 = vadd.f32 %v331_v8, %v247_v37  ;;  %764 = vset.pattern.permute.xlu1 %v770_v1 }
  0xde   :  { %v309_v7 = vpop.permute.xlu1 %308  ;;  %650 = vperm.xlu1 %764, %v580_v25   ;;  %v228_v10 = vpop.permute.xlu0 %227 }
  0xdf   :  { %v333_v6 = vmul.f32 %v1052_v2, %v309_v7  ;;  %v249_v14 = vadd.f32 %v228_v10, %v153_v11 }
  0xe1   :  { %v1181_v16 = vadd.f32 %v333_v6, %v249_v14 }
  0xe2   :  { %660 = vperm.xlu1 %764, %v582_v60   ;;  %v591_v4 = vpop.permute.xlu0 %590 }
  0xe3   :  { %v353_v13 = vpop.permute.xlu1 %352 }
  0xe4   :  { %v419_v1 = vmul.f32 %v1179_v15, %v353_v13 }
  0xe6   :  { %v435_v17 = vadd.f32 %v419_v1, %v335_v20 }
  0xe7   :  { %v361_v61 = vpop.permute.xlu1 %360  ;;  %v457_v5 = vpop.permute.xlu0 %456 }
  0xe8   :  { %v421_v2 = vmul.f32 %v1179_v15, %v361_v61 }
  0xea   :  { %v437_v23 = vadd.f32 %v421_v2, %v337_v29 }
  0xeb   :  { %v365_v24 = vpop.permute.xlu1 %364  ;;  %v469_v39 = vpop.permute.xlu0 %468 }
  0xec   :  { %v422_v26 = vmul.f32 %v1179_v15, %v365_v24 }
  0xee   :  { %v438_v28 = vadd.f32 %v422_v26, %v1078_v22 }
  0xef   :  { %v373_v30 = vpop.permute.xlu1 %372  ;;  %v1187_v31 = vpop.permute.xlu0 %476 }
  0xf0   :  { %v424_v38 = vmul.f32 %v1179_v15, %v373_v30 }
  0xf2   :  { %v1191_v19 = vadd.f32 %v424_v38, %v1090_v32  ;;  %v1205_v32 = vrot.slane %v1046_v63, %v517_v27 }
  0xf3   :  { %v381_v20 = vpop.permute.xlu1 %380  ;;  %v1193_v33 = vpop.permute.xlu0 %488 }
  0xf4   :  { %v426_v40 = vmul.f32 %v1179_v15, %v381_v20  ;;  %v520_v47 = vmul.f32 %v1205_v32, %v457_v5  ;;  %v523_v1 = vmul.f32 %v1205_v32, %v469_v39 }
  0xf6   :  { %v1197_v29 = vadd.f32 %v426_v40, %v1096_v43 }
  0xf7   :  { %v389_v41 = vpop.permute.xlu1 %388 }
  0xf8   :  { %v428_v22 = vmul.f32 %v1179_v15, %v389_v41  ;;  %v357_v42 = vpop.permute.xlu0 %356 }
  0xf9   :  { %v420_v51 = vmul.f32 %v1179_v15, %v357_v42 }
  0xfa   :  { %v1202_v44 = vadd.f32 %v428_v22, %v1102_v52 }
  0xfb   :  { %v397_v35 = vpop.permute.xlu1 %396  ;;  %v436_v46 = vadd.f32 %v420_v51, %v1137_v18 }
  0xfc   :  { %v430_v53 = vmul.f32 %v1179_v15, %v397_v35  ;;  %v369_v9 = vpop.permute.xlu0 %368 }
  0xfd   :  { %v536_v52 = vadd.f32 %v520_v47, %v436_v46  ;;  %v423_v18 = vmul.f32 %v1179_v15, %v369_v9 }
  0xfe   :  { %v1210_v43 = vadd.f32 %v430_v53, %v1109_v59 }
  0xff   :  { %v552_v56 = vmax.f32 %v536_v52, 0.0  ;;  %v525_v52 = vmul.f32 %v1205_v32, %v1187_v31 }
 0x100   :  { %v453_v58 = vpop.permute.xlu1 %452  ;;  %v377_v36 = vpop.permute.xlu0 %376 }
 0x101   :  { %v519_v0 = vmul.f32 %v1205_v32, %v453_v58  ;;  %v664_v54 = vmul.f32 %v591_v4, %v552_v56  ;;  %v425_v53 = vmul.f32 %v1179_v15, %v377_v36 }
 0x103   :  { %v535_v3 = vadd.f32 %v519_v0, %v435_v17  ;;  %v681_v14 = vsel %vm679_vm0, %v664_v54, 0.0  ;;  %v439_v17 = vadd.f32 %v423_v18, %v1146_v34  ;;  %v441_v0 = vadd.f32 %v425_v53, %v1152_v45 }
 0x104   :  { %v461_v21 = vpop.permute.xlu1 %460  ;;  %v385_v63 = vpop.permute.xlu0 %384 }
 0x105   :  { %v551_v59 = vmax.f32 %v535_v3, 0.0  ;;  %v521_v7 = vmul.f32 %v1205_v32, %v461_v21  ;;  %v539_v30 = vadd.f32 %v523_v1, %v439_v17  ;;  %v541_v36 = vadd.f32 %v525_v52, %v441_v0 }
 0x106   :  { %v427_v45 = vmul.f32 %v1179_v15, %v385_v63 }
 0x107   :  { %v537_v61 = vadd.f32 %v521_v7, %v437_v23  ;;  %v555_v27 = vmax.f32 %v539_v30, 0.0 }
 0x108   :  { %v465_v8 = vpop.permute.xlu1 %464  ;;  %v1215_v37 = vpop.permute.xlu0 %392 }
 0x109   :  { %v522_v4 = vmul.f32 %v1205_v32, %v465_v8  ;;  %v553_v26 = vmax.f32 %v537_v61, 0.0  ;;  %v429_v30 = vmul.f32 %v1179_v15, %v1215_v37 }
 0x10b   :  { %v538_v24 = vadd.f32 %v522_v4, %v438_v28 }
 0x10c   :  { %v1217_v25 = vpop.permute.xlu0 %400 }
 0x10d   :  { %v586_v11 = vpop.permute.xlu1 %585  ;;  %v554_v22 = vmax.f32 %v538_v24, 0.0 }
 0x10e   :  { %v663_v10 = vmul.f32 %v586_v11, %v551_v59 }
 0x110   :  { %v680_v6 = vsel %vm679_vm0, %v663_v10, 0.0  ;;  %v1223_v60 = vpop.permute.xlu0 %404  ;;  %v557_v10 = vmax.f32 %v541_v36, 0.0 }
 0x111   :  { %v682_v13 = vadd.f32 %v681_v14, %v680_v6 }
 0x112   :  { %v473_v5 = vpop.permute.xlu1 %472 }
 0x113   :  { %v524_v28 = vmul.f32 %v1205_v32, %v473_v5  ;;  %v443_v5 = vadd.f32 %v427_v45, %v1157_v48  ;;  %v431_v48 = vmul.f32 %v1179_v15, %v1217_v25 }
 0x114   :  { %v1228_v2 = vpop.permute.xlu0 %408 }
 0x115   :  { %v540_v21 = vadd.f32 %v524_v28, %v1191_v19 }
 0x117   :  { %v596_v38 = vpop.permute.xlu1 %595  ;;  %v556_v8 = vmax.f32 %v540_v21, 0.0 }
 0x118   :  { %v665_v20 = vmul.f32 %v596_v38, %v553_v26 }
 0x119   :  { %v606_v40 = vpop.permute.xlu0 %605 }
 0x11a   :  { %v683_v41 = vsel %vm679_vm0, %v665_v20, 0.0  ;;  %v667_v35 = vmul.f32 %v606_v40, %v555_v27  ;;  %v528_v40 = vmul.f32 %v1205_v32, %v1193_v33  ;;  %v447_v33 = vadd.f32 %v431_v48, %v1171_v12 }
 0x11b   :  { %v684_v42 = vadd.f32 %v683_v41, %v682_v13  ;;  %v601_v39 = vpop.permute.xlu1 %600  ;;  %v445_v41 = vadd.f32 %v429_v30, %v1162_v49 }
 0x11c   :  { %v666_v34 = vmul.f32 %v601_v39, %v554_v22  ;;  %v687_v9 = vsel %vm679_vm0, %v667_v35, 0.0 }
 0x11d   :  { %v621_v18 = vpop.permute.xlu0 %620 }
 0x11e   :  { %v685_v23 = vsel %vm679_vm0, %v666_v34, 0.0 }
 0x11f   :  { %v686_v51 = vadd.f32 %v685_v23, %v684_v42 }
 0x120   :  { %v481_v47 = vpop.permute.xlu1 %480 }
 0x121   :  { %v688_v46 = vadd.f32 %v687_v9, %v686_v51  ;;  %v526_v58 = vmul.f32 %v1205_v32, %v481_v47  ;;  %v636_v35 = vpop.permute.xlu0 %635  ;;  %v544_v51 = vadd.f32 %v528_v40, %v1202_v44 }
 0x123   :  { %v542_v3 = vadd.f32 %v526_v58, %v1197_v29  ;;  %v560_v47 = vmax.f32 %v544_v51, 0.0 }
 0x124   :  { %v485_v56 = vpop.permute.xlu1 %484 }
 0x125   :  { %v558_v54 = vmax.f32 %v542_v3, 0.0  ;;  %v527_v29 = vmul.f32 %v1205_v32, %v485_v56 }
 0x127   :  { %v670_v13 = vmul.f32 %v621_v18, %v558_v54  ;;  %v543_v24 = vadd.f32 %v527_v29, %v443_v5 }
 0x129   :  { %v611_v59 = vpop.permute.xlu1 %610  ;;  %v693_v17 = vsel %vm679_vm0, %v670_v13, 0.0  ;;  %v559_v20 = vmax.f32 %v543_v24, 0.0 }
 0x12a   :  { %v668_v11 = vmul.f32 %v611_v59, %v556_v8 }
 0x12c   :  { %v689_v7 = vsel %vm679_vm0, %v668_v11, 0.0 }
 0x12d   :  { %v690_v6 = vadd.f32 %v689_v7, %v688_v46  ;;  %v616_v14 = vpop.permute.xlu1 %615  ;;  %v641_v46 = vpop.permute.xlu0 %640 }
 0x12e   :  { %v669_v31 = vmul.f32 %v616_v14, %v557_v10  ;;  %v433_v10 = vmul.f32 %v1179_v15, %v1228_v2 }
 0x130   :  { %v691_v19 = vsel %vm679_vm0, %v669_v31, 0.0  ;;  %v449_v31 = vadd.f32 %v433_v10, %v1181_v16 }
 0x131   :  { %v692_v1 = vadd.f32 %v691_v19, %v690_v6  ;;  %v432_v6 = vmul.f32 %v1179_v15, %v1223_v60 }
 0x132   :  { %v493_v61 = vpop.permute.xlu1 %492 }
 0x133   :  { %v694_v4 = vadd.f32 %v693_v17, %v692_v1  ;;  %v529_v38 = vmul.f32 %v1205_v32, %v493_v61  ;;  %v448_v19 = vadd.f32 %v432_v6, %v1119_v50 }
 0x135   :  { %v545_v42 = vadd.f32 %v529_v38, %v445_v41 }
 0x136   :  { %v497_v26 = vpop.permute.xlu1 %496 }
 0x137   :  { %v530_v27 = vmul.f32 %v1205_v32, %v497_v26  ;;  %v561_v53 = vmax.f32 %v545_v42, 0.0 }
 0x139   :  { %v546_v34 = vadd.f32 %v530_v27, %v1210_v43  ;;  %v673_v58 = vmul.f32 %v636_v35, %v561_v53  ;;  %v646_v43 = vpop.permute.xlu0 %645 }
 0x13b   :  { %v626_v63 = vpop.permute.xlu1 %625  ;;  %v562_v9 = vmax.f32 %v546_v34, 0.0  ;;  %v699_v44 = vsel %vm679_vm0, %v673_v58, 0.0 }
 0x13c   :  { %v671_v22 = vmul.f32 %v626_v63, %v559_v20 }
 0x13d   :  { %v674_v21 = vmul.f32 %v641_v46, %v562_v9  ;;  %v656_v26 = vpop.permute.xlu0 %655 }
 0x13e   :  { %v695_v39 = vsel %vm679_vm0, %v671_v22, 0.0 }
 0x13f   :  { %v696_v37 = vadd.f32 %v695_v39, %v694_v4  ;;  %v701_v59 = vsel %vm679_vm0, %v674_v21, 0.0 }
 0x140   :  { %v501_v23 = vpop.permute.xlu1 %500 }
 0x141   :  { %v531_v49 = vmul.f32 %v1205_v32, %v501_v23  ;;  %v721_v35 = vpop.permute.xlu0 %720 }
 0x142   :  { %v726_v34 = vrot.slane %v721_v35, %v137_v62 }
 0x143   :  { %v547_v28 = vadd.f32 %v531_v49, %v447_v33 }
 0x145   :  { %v631_v25 = vpop.permute.xlu1 %630  ;;  %v563_v52 = vmax.f32 %v547_v28, 0.0 }
 0x146   :  { %v672_v0 = vmul.f32 %v631_v25, %v560_v47 }
 0x147   :  { %v675_v8 = vmul.f32 %v646_v43, %v563_v52 }
 0x148   :  { %v697_v56 = vsel %vm679_vm0, %v672_v0, 0.0 }
 0x149   :  { %v698_v3 = vadd.f32 %v697_v56, %v696_v37  ;;  %v703_v11 = vsel %vm679_vm0, %v675_v8, 0.0 }
 0x14a   :  { %v505_v12 = vpop.permute.xlu1 %504 }
 0x14b   :  { %v700_v36 = vadd.f32 %v699_v44, %v698_v3  ;;  %v532_v14 = vmul.f32 %v1205_v32, %v505_v12 }
 0x14d   :  { %v702_v54 = vadd.f32 %v701_v59, %v700_v36  ;;  %v548_v17 = vadd.f32 %v532_v14, %v448_v19 }
 0x14f   :  { %v413_v18 = vpop.permute.xlu1 %412  ;;  %v704_v7 = vadd.f32 %v703_v11, %v702_v54  ;;  %v564_v24 = vmax.f32 %v548_v17, 0.0 }
 0x150   :  { %v434_v1 = vmul.f32 %v1179_v15, %v413_v18 }
 0x152   :  { %v450_v2 = vadd.f32 %v434_v1, %v1125_v55 }
 0x154   :  { %v509_v13 = vpop.permute.xlu1 %508 }
 0x155   :  { %v533_v45 = vmul.f32 %v1205_v32, %v509_v13 }
 0x157   :  { %v549_v29 = vadd.f32 %v533_v45, %v449_v31 }
 0x158   :  { %v513_v61 = vpop.permute.xlu1 %512 }
 0x159   :  { %v534_v4 = vmul.f32 %v1205_v32, %v513_v61  ;;  %v565_v5 = vmax.f32 %v549_v29, 0.0 }
 0x15b   :  { %v550_v60 = vadd.f32 %v534_v4, %v450_v2  ;;  %v677_v38 = vmul.f32 %v656_v26, %v565_v5 }
 0x15d   :  { %v651_v30 = vpop.permute.xlu1 %650  ;;  %v566_v63 = vmax.f32 %v550_v60, 0.0  ;;  %v707_v41 = vsel %vm679_vm0, %v677_v38, 0.0 }
 0x15e   :  { %v676_v16 = vmul.f32 %v651_v30, %v564_v24 }
 0x160   :  { %v705_v20 = vsel %vm679_vm0, %v676_v16, 0.0 }
 0x161   :  { %v706_v50 = vadd.f32 %v705_v20, %v704_v7  ;;  %v661_v40 = vpop.permute.xlu1 %660 }
 0x162   :  { %v678_v15 = vmul.f32 %v661_v40, %v566_v63 }
 0x163   :  { %v708_v27 = vadd.f32 %v707_v41, %v706_v50 }
 0x164   :  { %v709_v32 = vsel %vm679_vm0, %v678_v15, 0.0 }
 0x165   :  { %v710_v22 = vadd.f32 %v709_v32, %v708_v27 }
 0x167   :  { %v711_v55 = vrot.slane %v710_v22, 4 }
 0x169   :  { %v712_v48 = vadd.f32 %v711_v55, %v710_v22 }
 0x16b   :  { %v713_v42 = vrot.slane %v712_v48, 2 }
 0x16d   :  { %v714_v39 = vadd.f32 %v713_v42, %v712_v48 }
 0x16f   :  { %v715_v37 = vrot.slane %v714_v39, 1 }
 0x171   :  { %v716_v23 = vadd.f32 %v715_v37, %v714_v39 }
 0x173   :  { %v727_v51 = vadd.f32 %v726_v34, %v716_v23 }
 0x175   :  { %v728_v33 = vsub.f32 0.0, %v727_v51 }
 0x177   :  { %v729_v49 = vmul.f32 1.442695, %v728_v33 }
 0x179   :  { %765 = vpow2.f32 %v729_v49 }
 0x183   :  { %v766_v53 = vpop.eup %765 }
 0x184   :  { %v731_v28 = vadd.f32 1.0, %v766_v53 }
 0x186   :  { %767 = vrcp.f32 %v731_v28 }
 0x190   :  { %v768_v9 = vpop.eup %767 }
 0x191   :  { %734 = vst.msk [vmem:[%s1289_s5] sm:$0x1] %vm733_vm1, %v768_v9 }

</bundles_post_ra>
